<compile_context>
chip_gen: v7x
topology: tpu7x:2x2x1
jax: 0.10.0
libtpu: 0.0.40
codegen_flags: <defaults>
</compile_context>

<pallas_src>
import functools
import math

import jax
import jax.numpy as jnp
from jax.experimental import pallas as pl
from jax.experimental.pallas import tpu as pltpu

SMOOTH = 0.01
LANE = 128
SUBLANE = 8


def _soft_dice_stats_kernel(x_ref, t_ref, out_ref, *, n_classes, tile_rows,
                            half_tiles, total_px, needs_mask, needs_sanitize):
    """One spatial tile of per-(batch, class) dice / CE partial sums.

    x_ref:   (1, C, TS, 128)      raw logits (any float dtype)
    t_ref:   (1, TS, 128)         integer class ids (int8/uint8/int32/...)
    out_ref: (1, 1, 3*C + 1, 128) f32 accumulator, resident per (split, batch)
             rows 0..C-1   : sum_p  (softmax prob mass per class)
             rows C..2C-1  : sum_t  (one-hot pixel counts per class)
             rows 2C..3C-1 : sum_pt (intersection per class)
             row  3C       : sum of CE nll over pixels with target > 0
    """
    C = n_classes
    TS = tile_rows
    h = pl.program_id(0)
    s = pl.program_id(2)

    @pl.when(s == 0)
    def _():
        out_ref[...] = jnp.zeros_like(out_ref)

    tgt = t_ref[0].astype(jnp.int32)                       # (TS, 128)

    if needs_mask:
        # Global pixel index of every (row, lane) element of this *logical*
        # tile; pixels past the true pixel count (lane padding, the partial
        # last block, or a phantom tile on the TC-split axis) contribute 0.
        tile_id = h * half_tiles + s
        r = jax.lax.broadcasted_iota(jnp.int32, (TS, LANE), 0)
        l = jax.lax.broadcasted_iota(jnp.int32, (TS, LANE), 1)
        gpx = (tile_id * TS + r) * LANE + l
        valid = gpx < total_px
        one = valid.astype(jnp.float32)                    # masked "1.0"
    else:
        valid = None
        one = jnp.float32(1.0)

    # Per-class f32 logits.  Only sanitize (kill possible NaN garbage in the
    # partial last block's out-of-bounds rows) when the rows are not
    # tile-divisible.
    xs = []
    for c in range(C):
        xc = x_ref[0, c].astype(jnp.float32)               # (TS, 128)
        if needs_sanitize:
            xc = jnp.where(valid, xc, 0.0)
        xs.append(xc)

    # Numerically stable softmax along the (leading) class axis: everything
    # is a per-slab VPU op; exp / reciprocal / log ride the EUP slot.
    m = xs[0]
    for c in range(1, C):
        m = jnp.maximum(m, xs[c])
    es = [jnp.exp(xc - m) for xc in xs]
    denom = es[0]
    for c in range(1, C):
        denom = denom + es[c]
    inv = pl.reciprocal(denom, approx=True)                # dice path only
    if needs_mask:
        inv = inv * one                                    # zero invalid pixels

    def rowsum(a):                                         # (TS,128) -> (128,)
        if TS % SUBLANE == 0 and TS > SUBLANE:
            a = a.reshape(TS // SUBLANE, SUBLANE, LANE).sum(axis=0)
        return a.sum(axis=0)

    x_t = jnp.zeros((TS, LANE), jnp.float32)
    for c in range(C):
        p_c = es[c] * inv
        is_c = tgt == c
        t_c = jnp.where(is_c, one, 0.0)                    # masked one-hot
        pt_c = jnp.where(is_c, p_c, 0.0)                   # intersection
        x_t = x_t + jnp.where(is_c, xs[c], 0.0)            # logit of target
        out_ref[0, 0, c, :] += rowsum(p_c)
        out_ref[0, 0, C + c, :] += rowsum(t_c)
        out_ref[0, 0, 2 * C + c, :] += rowsum(pt_c)

    # Exact cross entropy (ignore_index == 0) in logsumexp form:
    #   nll = logsumexp(x) - x_t = (m - x_t) + log(sum_c exp(x_c - m))
    ce_valid = jnp.where(tgt > 0, one, 0.0)
    nll = (m - x_t + jnp.log(denom)) * ce_valid
    out_ref[0, 0, 3 * C, :] += rowsum(nll)


def _min_sublane(itemsize):
    # Native second-minor tile size: 8 for 4-byte, 16 for 2-byte, 32 for 1-byte.
    return 8 * (4 // int(itemsize))


def soft_dice_loss(logits_nchw, target_nchw, n_classes, *, tile_rows=1024):
    """logits_nchw: [B, C, H, W] float; target_nchw: [B, 1, H, W] int ids."""
    B, C = logits_nchw.shape[0], logits_nchw.shape[1]
    assert C == n_classes
    S = math.prod(logits_nchw.shape[2:])

    # Flatten spatial dims (free, row-major); logits keep their dtype (bf16
    # logits are DMA'd as bf16 and cast to f32 inside the kernel).
    x = logits_nchw.reshape(B, C, S)
    t = target_nchw.reshape(B, S)
    # Keep the target DMA narrow: any integer dtype of itemsize <= 4 passes
    # through unchanged; the cast to int32 happens after the load, in-kernel.
    if (not jnp.issubdtype(t.dtype, jnp.integer)) or t.dtype.itemsize > 4:
        t = t.astype(jnp.int32)

    lbytes = x.dtype.itemsize
    tbytes = t.dtype.itemsize
    quantum = max(_min_sublane(lbytes), _min_sublane(tbytes))

    # Pack pixels lane-dense: S -> (rows, 128).  Pad only to LANE granularity,
    # and only when needed; tile-size remainders are handled by a partial last
    # block + in-kernel masking (no full-tensor pad pass any more).
    rows = pl.cdiv(S, LANE)
    s_pad = rows * LANE
    if s_pad != S:
        x = jnp.pad(x, ((0, 0), (0, 0), (0, s_pad - S)))
        t = jnp.pad(t, ((0, 0), (0, s_pad - S)))
    x = x.reshape(B, C, rows, LANE)
    t = t.reshape(B, rows, LANE)

    # Tile-size selection against a per-generation VMEM budget (v7x only has
    # 64 MiB physical / 32 MiB scoped-default VMEM).
    try:
        vmem_cap = int(pltpu.get_tpu_info().vmem_capacity_bytes)
    except Exception:  # fall back to the smallest generation (v7x)
        vmem_cap = 64 * 1024 * 1024
    budget = max(8 << 20, min(24 << 20, vmem_cap // 4))
    per_row = LANE * (2 * C * lbytes          # double-buffered logits block
                      + (C + 8) * 4           # in-kernel f32 temporaries
                      + 2 * tbytes + 4)       # double-buffered target + i32 cast
    fit = max(quantum, (int(budget // per_row) // quantum) * quantum)
    req = max(quantum, (int(tile_rows) // quantum) * quantum)
    ts_rows = min(req, fit)
    if rows <= ts_rows:
        ts_rows = rows                        # single (possibly ragged) tile
    n_tiles = pl.cdiv(rows, ts_rows)

    # Leading grid axis of 2 so both v7x TensorCores get work even when B is
    # small/odd; a pure loop reorder on single-TC v5e/v6e.
    split = 2 if n_tiles >= 2 else 1
    half = pl.cdiv(n_tiles, split)
    needs_sanitize = (n_tiles * ts_rows != rows)          # garbage tail rows
    needs_mask = needs_sanitize or (s_pad != S) or (split * half != n_tiles)

    n_stats = 3 * C + 1
    last = n_tiles - 1

    kernel = functools.partial(
        _soft_dice_stats_kernel, n_classes=C, tile_rows=ts_rows,
        half_tiles=half, total_px=S, needs_mask=needs_mask,
        needs_sanitize=needs_sanitize)

    stats = pl.pallas_call(
        kernel,
        out_shape=jax.ShapeDtypeStruct((split, B, n_stats, LANE), jnp.float32),
        grid_spec=pltpu.PrefetchScalarGridSpec(
            num_scalar_prefetch=0,
            grid=(split, B, half),
            in_specs=[
                pl.BlockSpec(
                    (1, C, ts_rows, LANE),
                    lambda h, b, s: (b, 0, jnp.minimum(h * half + s, last), 0)),
                pl.BlockSpec(
                    (1, ts_rows, LANE),
                    lambda h, b, s: (b, jnp.minimum(h * half + s, last), 0)),
            ],
            out_specs=pl.BlockSpec((1, 1, n_stats, LANE),
                                   lambda h, b, s: (h, b, 0, 0)),
        ),
        compiler_params=pltpu.CompilerParams(
            dimension_semantics=("parallel", "parallel", "arbitrary"),
            vmem_limit_bytes=32 * 1024 * 1024,
        ),
    )(x, t)

    # --- tiny finalization in plain JAX ------------------------------------
    per_b = jnp.sum(stats, axis=(0, 3))                 # (B, 3C+1)
    sum_p = per_b[:, 0:C]
    sum_t = per_b[:, C:2 * C]
    sum_pt = per_b[:, 2 * C:3 * C]
    ce_sum = jnp.sum(per_b[:, 3 * C])
    ce_cnt = jnp.sum(sum_t[:, 1:])                      # pixels with class > 0

    inter = sum_pt + SMOOTH
    union = sum_p + sum_t + SMOOTH
    score = jnp.sum(2.0 * inter / union)
    score = 1.0 - score / (float(B) * float(C))
    ce = ce_sum / jnp.maximum(ce_cnt, 1.0)              # guard: all ignored
    return score + ce


def _reference_loss(logits, target, n_classes):
    """Pure-JAX reference of the intended forward semantics."""
    B, C = logits.shape[0], logits.shape[1]
    xf = logits.reshape(B, C, -1).astype(jnp.float32)
    tf = target.reshape(B, -1).astype(jnp.int32)
    p = jax.nn.softmax(xf, axis=1)
    onehot = jax.nn.one_hot(tf, C, axis=1, dtype=jnp.float32)
    inter = jnp.sum(p * onehot, axis=2) + SMOOTH
    union = jnp.sum(p, axis=2) + jnp.sum(onehot, axis=2) + SMOOTH
    score = jnp.sum(2.0 * inter / union)
    score = 1.0 - score / (float(B) * float(C))
    logp = jax.nn.log_softmax(xf, axis=1)
    nll = -jnp.take_along_axis(logp, tf[:, None, :], axis=1)[:, 0, :]
    mask = (tf != 0).astype(jnp.float32)
    ce = jnp.sum(nll * mask) / jnp.maximum(jnp.sum(mask), 1.0)
    return score + ce


if __name__ == "__main__":
    key = jax.random.PRNGKey(0)

    def _check(logits, target, n_classes, **kw):
        loss = soft_dice_loss(logits, target, n_classes, **kw)
        jax.block_until_ready(loss)
        ref = _reference_loss(logits, target, n_classes)
        assert loss.shape == () and bool(jnp.isfinite(loss)), loss
        assert bool(jnp.allclose(loss, ref, rtol=1e-2, atol=1e-2)), (loss, ref)

    # 1) basic: divisible shapes, int32 target, single tile, no masking.
    k1, k2, key = jax.random.split(key, 3)
    B, C, H, W = 2, 4, 16, 16
    logits = jax.random.normal(k1, (B, C, H, W), dtype=jnp.float32)
    target = jax.random.randint(k2, (B, 1, H, W), 0, C, dtype=jnp.int32)
    _check(logits, target, C)

    # 2) ragged spatial size: lane padding + partial last tile (sanitize) +
    #    phantom tile on the TensorCore-split axis, multi-tile accumulation.
    k1, k2, key = jax.random.split(key, 3)
    B, C, H, W = 1, 4, 70, 70
    logits = jax.random.normal(k1, (B, C, H, W), dtype=jnp.float32)
    target = jax.random.randint(k2, (B, 1, H, W), 0, C, dtype=jnp.int32)
    _check(logits, target, C, tile_rows=8)

    # 3) bf16 logits + uint8 target, single ragged tile with lane-pad masking.
    k1, k2, key = jax.random.split(key, 3)
    B, C, H, W = 2, 3, 40, 40
    logits = jax.random.normal(k1, (B, C, H, W), dtype=jnp.bfloat16)
    target = jax.random.randint(k2, (B, 1, H, W), 0, C,
                                dtype=jnp.int32).astype(jnp.uint8)
    _check(logits, target, C)

    # 4) uint8 target with multiple (32,128)-row tiles and the 2-way TC split.
    k1, k2, key = jax.random.split(key, 3)
    B, C, H, W = 1, 2, 128, 128
    logits = jax.random.normal(k1, (B, C, H, W), dtype=jnp.float32)
    target = jax.random.randint(k2, (B, 1, H, W), 0, C,
                                dtype=jnp.int32).astype(jnp.uint8)
    _check(logits, target, C, tile_rows=32)

    print("KERNEL_OK")
</pallas_src>

<mosaic_0001>
module attributes {stable_mosaic.version = 11 : i64} {
  func.func @_soft_dice_stats_kernel(%arg0: i32, %arg1: i32, %arg2: i32, %arg3: memref<1x4x2x128xf32, #tpu.memory_space<vmem>>, %arg4: memref<1x2x128xi32, #tpu.memory_space<vmem>>, %arg5: memref<1x1x13x128xf32, #tpu.memory_space<vmem>>) attributes {dimension_semantics = [#tpu.dimension_semantics<parallel>, #tpu.dimension_semantics<parallel>, #tpu.dimension_semantics<arbitrary>], iteration_bounds = array<i64: 1, 2, 1>, scalar_prefetch = 0 : i64, scratch_operands = 0 : i64, tpu.core_type = #tpu.core_type<tc>, window_params = [{transform_indices = @transform_0, window_bounds = array<i64: 1, 4, 2, 128>}, {transform_indices = @transform_1, window_bounds = array<i64: 1, 2, 128>}, {transform_indices = @transform_2, window_bounds = array<i64: 1, 1, 13, 128>}]} {
    %c0_i32 = arith.constant 0 : i32
    %0 = arith.cmpi eq, %arg2, %c0_i32 : i32
    %1 = arith.extui %0 : i1 to i32
    %c0_i32_0 = arith.constant 0 : i32
    %2 = arith.cmpi ne, %1, %c0_i32_0 : i32
    scf.if %2 {
      %cst_144 = arith.constant 0.000000e+00 : f32
      %173 = vector.broadcast %cst_144 : f32 to vector<1x1x13x128xf32>
      %c0_145 = arith.constant 0 : index
      %c0_146 = arith.constant 0 : index
      %c0_147 = arith.constant 0 : index
      %c0_148 = arith.constant 0 : index
      %174 = vector.load %arg5[%c0_145, %c0_146, %c0_147, %c0_148] : memref<1x1x13x128xf32, #tpu.memory_space<vmem>>, vector<1x1x13x128xf32>
      tpu.vector_store %arg5[%c0_145, %c0_146, %c0_147, %c0_148], %173 {strides = array<i32>} : memref<1x1x13x128xf32, #tpu.memory_space<vmem>>, vector<1x1x13x128xf32>,
    } else {
    }
    %c0 = arith.constant 0 : index
    %c0_1 = arith.constant 0 : index
    %c0_2 = arith.constant 0 : index
    %3 = vector.load %arg4[%c0, %c0_1, %c0_2] : memref<1x2x128xi32, #tpu.memory_space<vmem>>, vector<1x2x128xi32>
    %4 = vector.shape_cast %3 : vector<1x2x128xi32> to vector<2x128xi32>
    %c0_3 = arith.constant 0 : index
    %c0_4 = arith.constant 0 : index
    %c0_5 = arith.constant 0 : index
    %c0_6 = arith.constant 0 : index
    %5 = vector.load %arg3[%c0_3, %c0_4, %c0_5, %c0_6] : memref<1x4x2x128xf32, #tpu.memory_space<vmem>>, vector<1x1x2x128xf32>
    %6 = vector.shape_cast %5 : vector<1x1x2x128xf32> to vector<2x128xf32>
    %c0_7 = arith.constant 0 : index
    %c1 = arith.constant 1 : index
    %c0_8 = arith.constant 0 : index
    %c0_9 = arith.constant 0 : index
    %7 = vector.load %arg3[%c0_7, %c1, %c0_8, %c0_9] : memref<1x4x2x128xf32, #tpu.memory_space<vmem>>, vector<1x1x2x128xf32>
    %8 = vector.shape_cast %7 : vector<1x1x2x128xf32> to vector<2x128xf32>
    %c0_10 = arith.constant 0 : index
    %c2 = arith.constant 2 : index
    %c0_11 = arith.constant 0 : index
    %c0_12 = arith.constant 0 : index
    %9 = vector.load %arg3[%c0_10, %c2, %c0_11, %c0_12] : memref<1x4x2x128xf32, #tpu.memory_space<vmem>>, vector<1x1x2x128xf32>
    %10 = vector.shape_cast %9 : vector<1x1x2x128xf32> to vector<2x128xf32>
    %c0_13 = arith.constant 0 : index
    %c3 = arith.constant 3 : index
    %c0_14 = arith.constant 0 : index
    %c0_15 = arith.constant 0 : index
    %11 = vector.load %arg3[%c0_13, %c3, %c0_14, %c0_15] : memref<1x4x2x128xf32, #tpu.memory_space<vmem>>, vector<1x1x2x128xf32>
    %12 = vector.shape_cast %11 : vector<1x1x2x128xf32> to vector<2x128xf32>
    %13 = arith.maximumf %6, %8 : vector<2x128xf32>
    %14 = arith.maximumf %13, %10 : vector<2x128xf32>
    %15 = arith.maximumf %14, %12 : vector<2x128xf32>
    %16 = arith.subf %6, %15 : vector<2x128xf32>
    %17 = math.exp %16 : vector<2x128xf32>
    %18 = arith.subf %8, %15 : vector<2x128xf32>
    %19 = math.exp %18 : vector<2x128xf32>
    %20 = arith.subf %10, %15 : vector<2x128xf32>
    %21 = math.exp %20 : vector<2x128xf32>
    %22 = arith.subf %12, %15 : vector<2x128xf32>
    %23 = math.exp %22 : vector<2x128xf32>
    %24 = arith.addf %17, %19 : vector<2x128xf32>
    %25 = arith.addf %24, %21 : vector<2x128xf32>
    %26 = arith.addf %25, %23 : vector<2x128xf32>
    %27 = tpu.reciprocal %26 {approx = true} : vector<2x128xf32> -> vector<2x128xf32>
    %cst = arith.constant 0.000000e+00 : f32
    %28 = vector.broadcast %cst : f32 to vector<2x128xf32>
    %29 = arith.mulf %17, %27 : vector<2x128xf32>
    %c0_i32_16 = arith.constant 0 : i32
    %30 = vector.broadcast %c0_i32_16 : i32 to vector<2x128xi32>
    %31 = arith.cmpi eq, %4, %30 : vector<2x128xi32>
    %cst_17 = arith.constant 1.000000e+00 : f32
    %cst_18 = arith.constant 0.000000e+00 : f32
    %32 = vector.broadcast %cst_17 : f32 to vector<2x128xf32>
    %33 = vector.broadcast %cst_18 : f32 to vector<2x128xf32>
    %34 = arith.select %31, %32, %33 : vector<2x128xi1>, vector<2x128xf32>
    %cst_19 = arith.constant 0.000000e+00 : f32
    %35 = vector.broadcast %cst_19 : f32 to vector<2x128xf32>
    %36 = arith.select %31, %29, %35 : vector<2x128xi1>, vector<2x128xf32>
    %cst_20 = arith.constant 0.000000e+00 : f32
    %37 = vector.broadcast %cst_20 : f32 to vector<2x128xf32>
    %38 = arith.select %31, %6, %37 : vector<2x128xi1>, vector<2x128xf32>
    %39 = arith.addf %28, %38 : vector<2x128xf32>
    %c0_21 = arith.constant 0 : index
    %c0_22 = arith.constant 0 : index
    %c0_23 = arith.constant 0 : index
    %c0_24 = arith.constant 0 : index
    %40 = vector.load %arg5[%c0_21, %c0_22, %c0_23, %c0_24] : memref<1x1x13x128xf32, #tpu.memory_space<vmem>>, vector<1x1x1x128xf32>
    %41 = vector.shape_cast %40 : vector<1x1x1x128xf32> to vector<128xf32>
    %cst_25 = arith.constant dense<0.000000e+00> : vector<128xf32>
    %42 = vector.multi_reduction <add>, %29, %cst_25 [0] : vector<2x128xf32> to vector<128xf32>
    %43 = arith.addf %41, %42 : vector<128xf32>
    %c0_26 = arith.constant 0 : index
    %c0_27 = arith.constant 0 : index
    %c0_28 = arith.constant 0 : index
    %c0_29 = arith.constant 0 : index
    %44 = vector.load %arg5[%c0_26, %c0_27, %c0_28, %c0_29] : memref<1x1x13x128xf32, #tpu.memory_space<vmem>>, vector<1x1x1x128xf32>
    %45 = vector.shape_cast %44 : vector<1x1x1x128xf32> to vector<128xf32>
    %46 = vector.shape_cast %43 : vector<128xf32> to vector<1x1x1x128xf32>
    tpu.vector_store %arg5[%c0_26, %c0_27, %c0_28, %c0_29], %46 {strides = array<i32>} : memref<1x1x13x128xf32, #tpu.memory_space<vmem>>, vector<1x1x1x128xf32>,
    %c0_30 = arith.constant 0 : index
    %c0_31 = arith.constant 0 : index
    %c4 = arith.constant 4 : index
    %c0_32 = arith.constant 0 : index
    %47 = vector.load %arg5[%c0_30, %c0_31, %c4, %c0_32] : memref<1x1x13x128xf32, #tpu.memory_space<vmem>>, vector<1x1x1x128xf32>
    %48 = vector.shape_cast %47 : vector<1x1x1x128xf32> to vector<128xf32>
    %cst_33 = arith.constant dense<0.000000e+00> : vector<128xf32>
    %49 = vector.multi_reduction <add>, %34, %cst_33 [0] : vector<2x128xf32> to vector<128xf32>
    %50 = arith.addf %48, %49 : vector<128xf32>
    %c0_34 = arith.constant 0 : index
    %c0_35 = arith.constant 0 : index
    %c4_36 = arith.constant 4 : index
    %c0_37 = arith.constant 0 : index
    %51 = vector.load %arg5[%c0_34, %c0_35, %c4_36, %c0_37] : memref<1x1x13x128xf32, #tpu.memory_space<vmem>>, vector<1x1x1x128xf32>
    %52 = vector.shape_cast %51 : vector<1x1x1x128xf32> to vector<128xf32>
    %53 = vector.shape_cast %50 : vector<128xf32> to vector<1x1x1x128xf32>
    tpu.vector_store %arg5[%c0_34, %c0_35, %c4_36, %c0_37], %53 {strides = array<i32>} : memref<1x1x13x128xf32, #tpu.memory_space<vmem>>, vector<1x1x1x128xf32>,
    %c0_38 = arith.constant 0 : index
    %c0_39 = arith.constant 0 : index
    %c8 = arith.constant 8 : index
    %c0_40 = arith.constant 0 : index
    %54 = vector.load %arg5[%c0_38, %c0_39, %c8, %c0_40] : memref<1x1x13x128xf32, #tpu.memory_space<vmem>>, vector<1x1x1x128xf32>
    %55 = vector.shape_cast %54 : vector<1x1x1x128xf32> to vector<128xf32>
    %cst_41 = arith.constant dense<0.000000e+00> : vector<128xf32>
    %56 = vector.multi_reduction <add>, %36, %cst_41 [0] : vector<2x128xf32> to vector<128xf32>
    %57 = arith.addf %55, %56 : vector<128xf32>
    %c0_42 = arith.constant 0 : index
    %c0_43 = arith.constant 0 : index
    %c8_44 = arith.constant 8 : index
    %c0_45 = arith.constant 0 : index
    %58 = vector.load %arg5[%c0_42, %c0_43, %c8_44, %c0_45] : memref<1x1x13x128xf32, #tpu.memory_space<vmem>>, vector<1x1x1x128xf32>
    %59 = vector.shape_cast %58 : vector<1x1x1x128xf32> to vector<128xf32>
    %60 = vector.shape_cast %57 : vector<128xf32> to vector<1x1x1x128xf32>
    tpu.vector_store %arg5[%c0_42, %c0_43, %c8_44, %c0_45], %60 {strides = array<i32>} : memref<1x1x13x128xf32, #tpu.memory_space<vmem>>, vector<1x1x1x128xf32>,
    %61 = arith.mulf %19, %27 : vector<2x128xf32>
    %c1_i32 = arith.constant 1 : i32
    %62 = vector.broadcast %c1_i32 : i32 to vector<2x128xi32>
    %63 = arith.cmpi eq, %4, %62 : vector<2x128xi32>
    %cst_46 = arith.constant 1.000000e+00 : f32
    %cst_47 = arith.constant 0.000000e+00 : f32
    %64 = vector.broadcast %cst_46 : f32 to vector<2x128xf32>
    %65 = vector.broadcast %cst_47 : f32 to vector<2x128xf32>
    %66 = arith.select %63, %64, %65 : vector<2x128xi1>, vector<2x128xf32>
    %cst_48 = arith.constant 0.000000e+00 : f32
    %67 = vector.broadcast %cst_48 : f32 to vector<2x128xf32>
    %68 = arith.select %63, %61, %67 : vector<2x128xi1>, vector<2x128xf32>
    %cst_49 = arith.constant 0.000000e+00 : f32
    %69 = vector.broadcast %cst_49 : f32 to vector<2x128xf32>
    %70 = arith.select %63, %8, %69 : vector<2x128xi1>, vector<2x128xf32>
    %71 = arith.addf %39, %70 : vector<2x128xf32>
    %c0_50 = arith.constant 0 : index
    %c0_51 = arith.constant 0 : index
    %c1_52 = arith.constant 1 : index
    %c0_53 = arith.constant 0 : index
    %72 = vector.load %arg5[%c0_50, %c0_51, %c1_52, %c0_53] : memref<1x1x13x128xf32, #tpu.memory_space<vmem>>, vector<1x1x1x128xf32>
    %73 = vector.shape_cast %72 : vector<1x1x1x128xf32> to vector<128xf32>
    %cst_54 = arith.constant dense<0.000000e+00> : vector<128xf32>
    %74 = vector.multi_reduction <add>, %61, %cst_54 [0] : vector<2x128xf32> to vector<128xf32>
    %75 = arith.addf %73, %74 : vector<128xf32>
    %c0_55 = arith.constant 0 : index
    %c0_56 = arith.constant 0 : index
    %c1_57 = arith.constant 1 : index
    %c0_58 = arith.constant 0 : index
    %76 = vector.load %arg5[%c0_55, %c0_56, %c1_57, %c0_58] : memref<1x1x13x128xf32, #tpu.memory_space<vmem>>, vector<1x1x1x128xf32>
    %77 = vector.shape_cast %76 : vector<1x1x1x128xf32> to vector<128xf32>
    %78 = vector.shape_cast %75 : vector<128xf32> to vector<1x1x1x128xf32>
    tpu.vector_store %arg5[%c0_55, %c0_56, %c1_57, %c0_58], %78 {strides = array<i32>} : memref<1x1x13x128xf32, #tpu.memory_space<vmem>>, vector<1x1x1x128xf32>,
    %c0_59 = arith.constant 0 : index
    %c0_60 = arith.constant 0 : index
    %c5 = arith.constant 5 : index
    %c0_61 = arith.constant 0 : index
    %79 = vector.load %arg5[%c0_59, %c0_60, %c5, %c0_61] : memref<1x1x13x128xf32, #tpu.memory_space<vmem>>, vector<1x1x1x128xf32>
    %80 = vector.shape_cast %79 : vector<1x1x1x128xf32> to vector<128xf32>
    %cst_62 = arith.constant dense<0.000000e+00> : vector<128xf32>
    %81 = vector.multi_reduction <add>, %66, %cst_62 [0] : vector<2x128xf32> to vector<128xf32>
    %82 = arith.addf %80, %81 : vector<128xf32>
    %c0_63 = arith.constant 0 : index
    %c0_64 = arith.constant 0 : index
    %c5_65 = arith.constant 5 : index
    %c0_66 = arith.constant 0 : index
    %83 = vector.load %arg5[%c0_63, %c0_64, %c5_65, %c0_66] : memref<1x1x13x128xf32, #tpu.memory_space<vmem>>, vector<1x1x1x128xf32>
    %84 = vector.shape_cast %83 : vector<1x1x1x128xf32> to vector<128xf32>
    %85 = vector.shape_cast %82 : vector<128xf32> to vector<1x1x1x128xf32>
    tpu.vector_store %arg5[%c0_63, %c0_64, %c5_65, %c0_66], %85 {strides = array<i32>} : memref<1x1x13x128xf32, #tpu.memory_space<vmem>>, vector<1x1x1x128xf32>,
    %c0_67 = arith.constant 0 : index
    %c0_68 = arith.constant 0 : index
    %c9 = arith.constant 9 : index
    %c0_69 = arith.constant 0 : index
    %86 = vector.load %arg5[%c0_67, %c0_68, %c9, %c0_69] : memref<1x1x13x128xf32, #tpu.memory_space<vmem>>, vector<1x1x1x128xf32>
    %87 = vector.shape_cast %86 : vector<1x1x1x128xf32> to vector<128xf32>
    %cst_70 = arith.constant dense<0.000000e+00> : vector<128xf32>
    %88 = vector.multi_reduction <add>, %68, %cst_70 [0] : vector<2x128xf32> to vector<128xf32>
    %89 = arith.addf %87, %88 : vector<128xf32>
    %c0_71 = arith.constant 0 : index
    %c0_72 = arith.constant 0 : index
    %c9_73 = arith.constant 9 : index
    %c0_74 = arith.constant 0 : index
    %90 = vector.load %arg5[%c0_71, %c0_72, %c9_73, %c0_74] : memref<1x1x13x128xf32, #tpu.memory_space<vmem>>, vector<1x1x1x128xf32>
    %91 = vector.shape_cast %90 : vector<1x1x1x128xf32> to vector<128xf32>
    %92 = vector.shape_cast %89 : vector<128xf32> to vector<1x1x1x128xf32>
    tpu.vector_store %arg5[%c0_71, %c0_72, %c9_73, %c0_74], %92 {strides = array<i32>} : memref<1x1x13x128xf32, #tpu.memory_space<vmem>>, vector<1x1x1x128xf32>,
    %93 = arith.mulf %21, %27 : vector<2x128xf32>
    %c2_i32 = arith.constant 2 : i32
    %94 = vector.broadcast %c2_i32 : i32 to vector<2x128xi32>
    %95 = arith.cmpi eq, %4, %94 : vector<2x128xi32>
    %cst_75 = arith.constant 1.000000e+00 : f32
    %cst_76 = arith.constant 0.000000e+00 : f32
    %96 = vector.broadcast %cst_75 : f32 to vector<2x128xf32>
    %97 = vector.broadcast %cst_76 : f32 to vector<2x128xf32>
    %98 = arith.select %95, %96, %97 : vector<2x128xi1>, vector<2x128xf32>
    %cst_77 = arith.constant 0.000000e+00 : f32
    %99 = vector.broadcast %cst_77 : f32 to vector<2x128xf32>
    %100 = arith.select %95, %93, %99 : vector<2x128xi1>, vector<2x128xf32>
    %cst_78 = arith.constant 0.000000e+00 : f32
    %101 = vector.broadcast %cst_78 : f32 to vector<2x128xf32>
    %102 = arith.select %95, %10, %101 : vector<2x128xi1>, vector<2x128xf32>
    %103 = arith.addf %71, %102 : vector<2x128xf32>
    %c0_79 = arith.constant 0 : index
    %c0_80 = arith.constant 0 : index
    %c2_81 = arith.constant 2 : index
    %c0_82 = arith.constant 0 : index
    %104 = vector.load %arg5[%c0_79, %c0_80, %c2_81, %c0_82] : memref<1x1x13x128xf32, #tpu.memory_space<vmem>>, vector<1x1x1x128xf32>
    %105 = vector.shape_cast %104 : vector<1x1x1x128xf32> to vector<128xf32>
    %cst_83 = arith.constant dense<0.000000e+00> : vector<128xf32>
    %106 = vector.multi_reduction <add>, %93, %cst_83 [0] : vector<2x128xf32> to vector<128xf32>
    %107 = arith.addf %105, %106 : vector<128xf32>
    %c0_84 = arith.constant 0 : index
    %c0_85 = arith.constant 0 : index
    %c2_86 = arith.constant 2 : index
    %c0_87 = arith.constant 0 : index
    %108 = vector.load %arg5[%c0_84, %c0_85, %c2_86, %c0_87] : memref<1x1x13x128xf32, #tpu.memory_space<vmem>>, vector<1x1x1x128xf32>
    %109 = vector.shape_cast %108 : vector<1x1x1x128xf32> to vector<128xf32>
    %110 = vector.shape_cast %107 : vector<128xf32> to vector<1x1x1x128xf32>
    tpu.vector_store %arg5[%c0_84, %c0_85, %c2_86, %c0_87], %110 {strides = array<i32>} : memref<1x1x13x128xf32, #tpu.memory_space<vmem>>, vector<1x1x1x128xf32>,
    %c0_88 = arith.constant 0 : index
    %c0_89 = arith.constant 0 : index
    %c6 = arith.constant 6 : index
    %c0_90 = arith.constant 0 : index
    %111 = vector.load %arg5[%c0_88, %c0_89, %c6, %c0_90] : memref<1x1x13x128xf32, #tpu.memory_space<vmem>>, vector<1x1x1x128xf32>
    %112 = vector.shape_cast %111 : vector<1x1x1x128xf32> to vector<128xf32>
    %cst_91 = arith.constant dense<0.000000e+00> : vector<128xf32>
    %113 = vector.multi_reduction <add>, %98, %cst_91 [0] : vector<2x128xf32> to vector<128xf32>
    %114 = arith.addf %112, %113 : vector<128xf32>
    %c0_92 = arith.constant 0 : index
    %c0_93 = arith.constant 0 : index
    %c6_94 = arith.constant 6 : index
    %c0_95 = arith.constant 0 : index
    %115 = vector.load %arg5[%c0_92, %c0_93, %c6_94, %c0_95] : memref<1x1x13x128xf32, #tpu.memory_space<vmem>>, vector<1x1x1x128xf32>
    %116 = vector.shape_cast %115 : vector<1x1x1x128xf32> to vector<128xf32>
    %117 = vector.shape_cast %114 : vector<128xf32> to vector<1x1x1x128xf32>
    tpu.vector_store %arg5[%c0_92, %c0_93, %c6_94, %c0_95], %117 {strides = array<i32>} : memref<1x1x13x128xf32, #tpu.memory_space<vmem>>, vector<1x1x1x128xf32>,
    %c0_96 = arith.constant 0 : index
    %c0_97 = arith.constant 0 : index
    %c10 = arith.constant 10 : index
    %c0_98 = arith.constant 0 : index
    %118 = vector.load %arg5[%c0_96, %c0_97, %c10, %c0_98] : memref<1x1x13x128xf32, #tpu.memory_space<vmem>>, vector<1x1x1x128xf32>
    %119 = vector.shape_cast %118 : vector<1x1x1x128xf32> to vector<128xf32>
    %cst_99 = arith.constant dense<0.000000e+00> : vector<128xf32>
    %120 = vector.multi_reduction <add>, %100, %cst_99 [0] : vector<2x128xf32> to vector<128xf32>
    %121 = arith.addf %119, %120 : vector<128xf32>
    %c0_100 = arith.constant 0 : index
    %c0_101 = arith.constant 0 : index
    %c10_102 = arith.constant 10 : index
    %c0_103 = arith.constant 0 : index
    %122 = vector.load %arg5[%c0_100, %c0_101, %c10_102, %c0_103] : memref<1x1x13x128xf32, #tpu.memory_space<vmem>>, vector<1x1x1x128xf32>
    %123 = vector.shape_cast %122 : vector<1x1x1x128xf32> to vector<128xf32>
    %124 = vector.shape_cast %121 : vector<128xf32> to vector<1x1x1x128xf32>
    tpu.vector_store %arg5[%c0_100, %c0_101, %c10_102, %c0_103], %124 {strides = array<i32>} : memref<1x1x13x128xf32, #tpu.memory_space<vmem>>, vector<1x1x1x128xf32>,
    %125 = arith.mulf %23, %27 : vector<2x128xf32>
    %c3_i32 = arith.constant 3 : i32
    %126 = vector.broadcast %c3_i32 : i32 to vector<2x128xi32>
    %127 = arith.cmpi eq, %4, %126 : vector<2x128xi32>
    %cst_104 = arith.constant 1.000000e+00 : f32
    %cst_105 = arith.constant 0.000000e+00 : f32
    %128 = vector.broadcast %cst_104 : f32 to vector<2x128xf32>
    %129 = vector.broadcast %cst_105 : f32 to vector<2x128xf32>
    %130 = arith.select %127, %128, %129 : vector<2x128xi1>, vector<2x128xf32>
    %cst_106 = arith.constant 0.000000e+00 : f32
    %131 = vector.broadcast %cst_106 : f32 to vector<2x128xf32>
    %132 = arith.select %127, %125, %131 : vector<2x128xi1>, vector<2x128xf32>
    %cst_107 = arith.constant 0.000000e+00 : f32
    %133 = vector.broadcast %cst_107 : f32 to vector<2x128xf32>
    %134 = arith.select %127, %12, %133 : vector<2x128xi1>, vector<2x128xf32>
    %135 = arith.addf %103, %134 : vector<2x128xf32>
    %c0_108 = arith.constant 0 : index
    %c0_109 = arith.constant 0 : index
    %c3_110 = arith.constant 3 : index
    %c0_111 = arith.constant 0 : index
    %136 = vector.load %arg5[%c0_108, %c0_109, %c3_110, %c0_111] : memref<1x1x13x128xf32, #tpu.memory_space<vmem>>, vector<1x1x1x128xf32>
    %137 = vector.shape_cast %136 : vector<1x1x1x128xf32> to vector<128xf32>
    %cst_112 = arith.constant dense<0.000000e+00> : vector<128xf32>
    %138 = vector.multi_reduction <add>, %125, %cst_112 [0] : vector<2x128xf32> to vector<128xf32>
    %139 = arith.addf %137, %138 : vector<128xf32>
    %c0_113 = arith.constant 0 : index
    %c0_114 = arith.constant 0 : index
    %c3_115 = arith.constant 3 : index
    %c0_116 = arith.constant 0 : index
    %140 = vector.load %arg5[%c0_113, %c0_114, %c3_115, %c0_116] : memref<1x1x13x128xf32, #tpu.memory_space<vmem>>, vector<1x1x1x128xf32>
    %141 = vector.shape_cast %140 : vector<1x1x1x128xf32> to vector<128xf32>
    %142 = vector.shape_cast %139 : vector<128xf32> to vector<1x1x1x128xf32>
    tpu.vector_store %arg5[%c0_113, %c0_114, %c3_115, %c0_116], %142 {strides = array<i32>} : memref<1x1x13x128xf32, #tpu.memory_space<vmem>>, vector<1x1x1x128xf32>,
    %c0_117 = arith.constant 0 : index
    %c0_118 = arith.constant 0 : index
    %c7 = arith.constant 7 : index
    %c0_119 = arith.constant 0 : index
    %143 = vector.load %arg5[%c0_117, %c0_118, %c7, %c0_119] : memref<1x1x13x128xf32, #tpu.memory_space<vmem>>, vector<1x1x1x128xf32>
    %144 = vector.shape_cast %143 : vector<1x1x1x128xf32> to vector<128xf32>
    %cst_120 = arith.constant dense<0.000000e+00> : vector<128xf32>
    %145 = vector.multi_reduction <add>, %130, %cst_120 [0] : vector<2x128xf32> to vector<128xf32>
    %146 = arith.addf %144, %145 : vector<128xf32>
    %c0_121 = arith.constant 0 : index
    %c0_122 = arith.constant 0 : index
    %c7_123 = arith.constant 7 : index
    %c0_124 = arith.constant 0 : index
    %147 = vector.load %arg5[%c0_121, %c0_122, %c7_123, %c0_124] : memref<1x1x13x128xf32, #tpu.memory_space<vmem>>, vector<1x1x1x128xf32>
    %148 = vector.shape_cast %147 : vector<1x1x1x128xf32> to vector<128xf32>
    %149 = vector.shape_cast %146 : vector<128xf32> to vector<1x1x1x128xf32>
    tpu.vector_store %arg5[%c0_121, %c0_122, %c7_123, %c0_124], %149 {strides = array<i32>} : memref<1x1x13x128xf32, #tpu.memory_space<vmem>>, vector<1x1x1x128xf32>,
    %c0_125 = arith.constant 0 : index
    %c0_126 = arith.constant 0 : index
    %c11 = arith.constant 11 : index
    %c0_127 = arith.constant 0 : index
    %150 = vector.load %arg5[%c0_125, %c0_126, %c11, %c0_127] : memref<1x1x13x128xf32, #tpu.memory_space<vmem>>, vector<1x1x1x128xf32>
    %151 = vector.shape_cast %150 : vector<1x1x1x128xf32> to vector<128xf32>
    %cst_128 = arith.constant dense<0.000000e+00> : vector<128xf32>
    %152 = vector.multi_reduction <add>, %132, %cst_128 [0] : vector<2x128xf32> to vector<128xf32>
    %153 = arith.addf %151, %152 : vector<128xf32>
    %c0_129 = arith.constant 0 : index
    %c0_130 = arith.constant 0 : index
    %c11_131 = arith.constant 11 : index
    %c0_132 = arith.constant 0 : index
    %154 = vector.load %arg5[%c0_129, %c0_130, %c11_131, %c0_132] : memref<1x1x13x128xf32, #tpu.memory_space<vmem>>, vector<1x1x1x128xf32>
    %155 = vector.shape_cast %154 : vector<1x1x1x128xf32> to vector<128xf32>
    %156 = vector.shape_cast %153 : vector<128xf32> to vector<1x1x1x128xf32>
    tpu.vector_store %arg5[%c0_129, %c0_130, %c11_131, %c0_132], %156 {strides = array<i32>} : memref<1x1x13x128xf32, #tpu.memory_space<vmem>>, vector<1x1x1x128xf32>,
    %c0_i32_133 = arith.constant 0 : i32
    %157 = vector.broadcast %c0_i32_133 : i32 to vector<2x128xi32>
    %158 = arith.cmpi sgt, %4, %157 : vector<2x128xi32>
    %cst_134 = arith.constant 1.000000e+00 : f32
    %cst_135 = arith.constant 0.000000e+00 : f32
    %159 = vector.broadcast %cst_134 : f32 to vector<2x128xf32>
    %160 = vector.broadcast %cst_135 : f32 to vector<2x128xf32>
    %161 = arith.select %158, %159, %160 : vector<2x128xi1>, vector<2x128xf32>
    %162 = arith.subf %15, %135 : vector<2x128xf32>
    %163 = math.log %26 : vector<2x128xf32>
    %164 = arith.addf %162, %163 : vector<2x128xf32>
    %165 = arith.mulf %164, %161 : vector<2x128xf32>
    %c0_136 = arith.constant 0 : index
    %c0_137 = arith.constant 0 : index
    %c12 = arith.constant 12 : index
    %c0_138 = arith.constant 0 : index
    %166 = vector.load %arg5[%c0_136, %c0_137, %c12, %c0_138] : memref<1x1x13x128xf32, #tpu.memory_space<vmem>>, vector<1x1x1x128xf32>
    %167 = vector.shape_cast %166 : vector<1x1x1x128xf32> to vector<128xf32>
    %cst_139 = arith.constant dense<0.000000e+00> : vector<128xf32>
    %168 = vector.multi_reduction <add>, %165, %cst_139 [0] : vector<2x128xf32> to vector<128xf32>
    %169 = arith.addf %167, %168 : vector<128xf32>
    %c0_140 = arith.constant 0 : index
    %c0_141 = arith.constant 0 : index
    %c12_142 = arith.constant 12 : index
    %c0_143 = arith.constant 0 : index
    %170 = vector.load %arg5[%c0_140, %c0_141, %c12_142, %c0_143] : memref<1x1x13x128xf32, #tpu.memory_space<vmem>>, vector<1x1x1x128xf32>
    %171 = vector.shape_cast %170 : vector<1x1x1x128xf32> to vector<128xf32>
    %172 = vector.shape_cast %169 : vector<128xf32> to vector<1x1x1x128xf32>
    tpu.vector_store %arg5[%c0_140, %c0_141, %c12_142, %c0_143], %172 {strides = array<i32>} : memref<1x1x13x128xf32, #tpu.memory_space<vmem>>, vector<1x1x1x128xf32>,
    return
  }
  func.func @transform_0(%arg0: i32, %arg1: i32, %arg2: i32) -> (i32, i32, i32, i32) {
    %c1_i32 = arith.constant 1 : i32
    %0 = arith.muli %arg0, %c1_i32 : i32
    %1 = arith.addi %0, %arg2 : i32
    %c0_i32 = arith.constant 0 : i32
    %2 = arith.minsi %1, %c0_i32 : i32
    %c0_i32_0 = arith.constant 0 : i32
    %c0_i32_1 = arith.constant 0 : i32
    %c0_i32_2 = arith.constant 0 : i32
    return %arg1, %c0_i32_0, %2, %c0_i32_1 : i32, i32, i32, i32
  }
  func.func @transform_1(%arg0: i32, %arg1: i32, %arg2: i32) -> (i32, i32, i32) {
    %c1_i32 = arith.constant 1 : i32
    %0 = arith.muli %arg0, %c1_i32 : i32
    %1 = arith.addi %0, %arg2 : i32
    %c0_i32 = arith.constant 0 : i32
    %2 = arith.minsi %1, %c0_i32 : i32
    %c0_i32_0 = arith.constant 0 : i32
    %c0_i32_1 = arith.constant 0 : i32
    return %arg1, %2, %c0_i32_0 : i32, i32, i32
  }
  func.func @transform_2(%arg0: i32, %arg1: i32, %arg2: i32) -> (i32, i32, i32, i32) {
    %c0_i32 = arith.constant 0 : i32
    %c0_i32_0 = arith.constant 0 : i32
    %c0_i32_1 = arith.constant 0 : i32
    return %arg0, %arg1, %c0_i32, %c0_i32_0 : i32, i32, i32, i32
  }
}

</mosaic_0001>

<bundles_post_ra>
// kernel: tpu_custom_call.1
= control target key start
LH: loop header
LB: loop body
LE: loop exit
PB: predicated region body
PF: predicated region fallthrough
CT: control target
= control target key end

     0   :  { %7 = vsyncpa [#allocation3], 0  ;;  %s1095_s0 = inlined_call_operand.hbm [shape: f32[2,4,2,128], index: 0, kind: input, shape index: {}]   ;;  %s1096_s1 = inlined_call_operand.hbm [shape: s32[2,2,128], index: 1, kind: input, shape index: {}]   ;;  %s1097_s2 = inlined_call_operand.vmem [shape: f32[1,2,13,128], index: 2, kind: output, shape index: {}]  }
   0x1   :  { %9 = vsyncpa [#allocation3 + $0x1], 0 }
   0x2   :  { %10 = vsyncpa [#allocation5], 0 }
   0x3   :  { %12 = vsyncpa [#allocation5 + $0x1], 0  ;;  %s811_s9 = smov 0   ;;  %s813_s10 = smov 0  }
   0x4   :  { %s815_s11 = smov 0   ;;  %s817_s12 = smov 0  }
   0x5   :  { %s819_s13 = smov 0   ;;  %s821_s14 = smov 0  }
   0x6 LB: > { %s579_s15 = sadd.s32 4294967295, %s789_s14   ;;  %s33_s16 = sadd.s32 1, %s785_s13  ;;  %s789_s14 = sphi %s821_s14, %s18_s14   ;;  %s785_s13 = sphi %s819_s13, %s1109_s13   ;;  %s781_s12 = sphi %s817_s12, %s1108_s12   ;;  %s777_s11 = sphi %s815_s11, %s1107_s11   ;;  %s773_s10 = sphi %s813_s10, %s1106_s10   ;;  %s769_s9 = sphi %s811_s9, %s1105_s9  }
   0x7   : > { %p35_p0 = scmp.ge.s32.totalorder %s33_s16, 2  ;;  %s52_s17 = sadd.s32 1, %s777_s11 }
   0x8   : > { %p59_p1 = scmp.ne.s32.totalorder %s777_s11, %s773_s10  ;;  %p60_p2 = scmp.eq.s32.totalorder %s789_s14, 0 }
   0x9   : > { %s1111_s16 = smov (%p35_p0, %s33_s16), 0  ;;  %p65_p4 = scmp.ne.s32.totalorder %s773_s10, %s769_s9 }
   0xa   : > { %p847_p3 = por %p60_p2, %p59_p1  ;;  %s47_s19 = ssub.s32 %s785_s13, %s1111_s16 }
   0xb   : > { %p66_p5 = scmp.eq.s32.totalorder %s579_s15, 0  ;;  %p50_p6 = scmp.eq.s32.totalorder %s47_s19, 0 }
   0xc   : > { %p611_p8 = scmp.lt.s32.totalorder %s789_s14, 2  ;;  %s863_s22 = sand.u32 1, %s777_s11  }
   0xd   : > { %p854_p7 = por %p66_p5, %p65_p4  ;;  %s598_s23 = sshll.u32 %s785_s13, 7 }
   0xe   : > { %s860_s21 = scalar_select %p50_p6, %s777_s11, %s52_s17  }
   0xf   : > { %s1100_s20 = scalar_select %p854_p7, 1, 0 }
  0x10   : > { %s583_s24 = sshll.u32 %s863_s22, 3  ;;  %s870_s27 = scalar_lea.hbm %s1095_s0, %s598_s23 }
  0x11   : > { %s155_s28 = scalar_lea.vmem [#allocation2], %s583_s24  ;;  %p874_p9 = pnand %p611_p8, %p847_p3 }
  0x12   : > { %s166_s29 = sshll.u32 %s155_s28, 4  ;;  %s152_s3 = scalar_lea.sflag [#allocation3], %s863_s22  ;;  %s878_s29 = int_to_ptr.vmem [resolvable:$true] %s166_s29 }
  0x13   : > { %s675_s4 = scalar_lea.hbm %s870_s27, 128  ;;  %p677_p11 = pneg %p874_p9 }
  0x14   : > { %p676_p10 = scmp.ne.s32.totalorder %s870_s27, %s675_s4  ;;  %s680_s7 = scalar_lea.hbm %s1095_s0, 256 }
  0x15   : > { %p681_p0 = scmp.lt.u32.totalorder %s870_s27, %s1095_s0  ;;  %p682_p1 = scmp.lt.u32.totalorder %s680_s7, %s675_s4 }
  0x16   : > { %p678_p12 = pnand %p677_p11, %p676_p10  ;;  %p684_p3 = scmp.lt.u32.totalorder %s675_s4, %s870_s27 }
  0x17   : > { %p683_p2 = por %p682_p1, %p681_p0 }
  0x18   : > { %p679_p13 = pneg %p678_p12 }
  0x19   : > { %p685_p4 = por %p684_p3, %p683_p2 }
  0x1b   : > { %p686_p5 = pnand %p685_p4, %p679_p13 }
  0x1d   : > { %689 = shalt.err (!%p686_p5)
}
  0x1e   : > { %s690_s15 = scalar_lea.vmem %s878_s29, 128  ;;  %s791_s17 = smov [#allocation2]  }
  0x1f   : > { %p691_p6 = scmp.ne.s32.totalorder %s878_s29, %s690_s15  ;;  %s695_s18 = sshll.u32 %s791_s17, 4  ;;  %s696_s18 = int_to_ptr.vmem [resolvable:$false] %s695_s18 }
  0x20   : > { %s697_s19 = scalar_lea.vmem %s696_s18, 256  ;;  %p698_p12 = scmp.lt.s32.totalorder %s878_s29, %s696_s18 }
  0x21   : > { %p693_p8 = pnand %p691_p6, %p677_p11  ;;  %p699_p0 = scmp.lt.s32.totalorder %s697_s19, %s690_s15 }
  0x23   : > { %p694_p10 = pneg %p693_p8  ;;  %p700_p1 = por %p699_p0, %p698_p12 }
  0x25   : > { %p701_p2 = pnand %p700_p1, %p694_p10 }
  0x27   : > { %704 = shalt.err (!%p701_p2)
}
  0x28   : > { %s792_s23 = smov 32   ;;  %s793_s24 = smov 2  }
  0x29   : > { %607 = dma.hbm_to_vmem [thread:$0]  (!%p874_p9), %s870_s27, 128, %s878_s29, %s152_s3, %s792_s23, %s792_s23, %s793_s24  }
  0x2a   : > { %p588_p13 = scmp.ge.s32.totalorder %s789_s14, 1  ;;  %p196_p3 = scmp.lt.s32.totalorder %s789_s14, 3 }
  0x2b   : > { %s586_s25 = sshll.u32 %s863_s22, 1  ;;  %s587_s28 = sshll.u32 %s785_s13, 5 }
  0x2c   : > { %p911_p4 = pnand %p588_p13, %p196_p3  ;;  %s180_s4 = scalar_lea.vmem [#allocation4], %s586_s25 }
  0x2d   : > { %s191_s5 = sshll.u32 %s180_s4, 4  ;;  %s919_s8 = scalar_lea.hbm %s1096_s1, %s587_s28  ;;  %s192_s5 = int_to_ptr.vmem [resolvable:$true] %s191_s5 }
  0x2e   : > { %s1102_s26 = scalar_select %p911_p4, 1, 0 }
  0x2f   : > { %s177_s27 = scalar_lea.sflag [#allocation5], %s863_s22  ;;  %s705_s29 = scalar_lea.hbm %s919_s8, 32 }
  0x30   : > { %p706_p5 = scmp.ne.s32.totalorder %s919_s8, %s705_s29  ;;  %s710_s15 = scalar_lea.hbm %s1096_s1, 64 }
  0x31   : > { %p711_p10 = scmp.lt.u32.totalorder %s919_s8, %s1096_s1  ;;  %p712_p12 = scmp.lt.u32.totalorder %s710_s15, %s705_s29 }
  0x32   : > { %p708_p6 = pnand %p706_p5, %p677_p11  ;;  %p714_p1 = scmp.lt.u32.totalorder %s705_s29, %s919_s8 }
  0x33   : > { %p713_p0 = por %p712_p12, %p711_p10 }
  0x34   : > { %p709_p8 = pneg %p708_p6 }
  0x35   : > { %p715_p2 = por %p714_p1, %p713_p0 }
  0x37   : > { %p716_p13 = pnand %p715_p2, %p709_p8 }
  0x39   : > { %719 = shalt.err (!%p716_p13)
}
  0x3a   : > { %s720_s22 = scalar_lea.vmem %s192_s5, 32  ;;  %s794_s19 = smov [#allocation4]  }
  0x3b   : > { %p721_p3 = scmp.ne.s32.totalorder %s192_s5, %s720_s22  ;;  %s725_s23 = sshll.u32 %s794_s19, 4  ;;  %s726_s23 = int_to_ptr.vmem [resolvable:$false] %s725_s23 }
  0x3c   : > { %s727_s24 = scalar_lea.vmem %s726_s23, 64  ;;  %p728_p7 = scmp.lt.s32.totalorder %s192_s5, %s726_s23 }
  0x3d   : > { %p723_p5 = pnand %p721_p3, %p677_p11  ;;  %p729_p4 = scmp.lt.s32.totalorder %s727_s24, %s720_s22 }
  0x3f   : > { %p724_p6 = pneg %p723_p5  ;;  %p730_p10 = por %p729_p4, %p728_p7 }
  0x41   : > { %p731_p12 = pnand %p730_p10, %p724_p6 }
  0x43   : > { %734 = shalt.err (!%p731_p12)
}
  0x44   : > { %610 = dma.hbm_to_vmem [thread:$0]  (!%p874_p9), %s919_s8, 32, %s192_s5, %s177_s27  }
  0x45   : > { %p1103_p8 = scmp.ne.s32.totalorder %s1102_s26, 0 }
  0x46   : > { %s202_s25 = sand.u32 (!%p1103_p8), 1, %s773_s10   ;;  %p1104_p11 = scmp.ne.s32.totalorder (!%p1103_p8), %s1100_s20, 0 }
  0x47   : > { %200 = sbr.rel (%p1103_p8) target bundleno = 160 (0xa0), region = 28  ;;  %s589_s28 = sshll.u32 (!%p1103_p8), %s202_s25, 3 }
  0x48   : > { %s203_s4 = scalar_lea.sflag (!%p1103_p8), [#allocation3], %s202_s25  ;;  %s206_s6 = scalar_lea.vmem (!%p1103_p8), [#allocation2], %s589_s28 }
  0x4e   : > { %760 = dma.done.wait (%p1104_p11), %s203_s4, 128  }
  0x4f   : > { %762 = vsyncadd (%p1104_p11), %s203_s4, 4294967168  ;;  %s590_s7 = sshll.u32 %s202_s25, 1  ;;  %s212_s29 = scalar_lea.sflag [#allocation5], %s202_s25 }
  0x50   : > { %s215_s30 = scalar_lea.vmem [#allocation4], %s590_s7 }
  0x51   : > { %764 = dma.done.wait (%p1104_p11), %s212_s29, 32  }
  0x52   : > { %766 = vsyncadd (%p1104_p11), %s212_s29, 4294967264  ;;  %p253_p7 = scmp.lt.s32.totalorder %s781_s12, 1  ;;  %v795_v0 = vmov 0.0   ;;  %v963_v1 = vld [vmem:[%s206_s6] sm:$0x3]  ;;  %vm300_vm0 = vcmask 1041408  }
  0x53   : > { %v965_v2 = vld [vmem:[%s206_s6 + $0x2] sm:$0x3]  ;;  %v967_v3 = vld [vmem:[%s206_s6 + $0x4] sm:$0x3]  ;;  %v971_v5 = vld [vmem:[%s215_s30] sm:$0x3] }
  0x54   : > { %s1113_s12 = smov (!%p253_p7, %s781_s12), 1  ;;  %v274_v4 = vmax.f32 %v963_v1, %v965_v2  ;;  %v973_v6 = vld [vmem:[%s206_s6 + $0x6] sm:$0x3]  ;;  %vm294_vm1 = vcmp.eq.s32.totalorder %v971_v5, 0  ;;  %vm331_vm2 = vcmp.eq.s32.totalorder %v971_v5, 1  ;;  %vm367_vm3 = vcmp.eq.s32.totalorder %v971_v5, 2 }
  0x55   : > { %s599_s26 = sshll.u32 %s1113_s12, 4  ;;  %v295_v8 = vsel %vm294_vm1, 1.0, %v795_v0  ;;  %v332_v9 = vsel %vm331_vm2, 1.0, %v795_v0  ;;  %v368_v15 = vsel %vm367_vm3, 1.0, %v795_v0  ;;  %vm403_vm4 = vcmp.eq.s32.totalorder %v971_v5, 3 }
  0x56   : > { %s957_s27 = scalar_lea.vmem %s1097_s2, %s599_s26  ;;  %v275_v7 = vmax.f32 %v274_v4, %v967_v3  ;;  %v311_v10 = vsel %vm300_vm0, %v295_v8, 0.0  ;;  %v347_v11 = vsel %vm300_vm0, %v332_v9, 0.0  ;;  %v383_v22 = vsel %vm300_vm0, %v368_v15, 0.0 }
  0x57   : > { %264 = vst [vmem:[%s957_s27] sm:$0xff] %v795_v0  ;;  %265 = vst [vmem:[%s957_s27 + $0x8] sm:$0x1f] %v795_v0  ;;  %v312_v13 = vrot.slane %v311_v10, 4  ;;  %v348_v14 = vrot.slane %v347_v11, 4  ;;  %v384_v29 = vrot.slane %v383_v22, 4  ;;  %v404_v30 = vsel %vm403_vm4, 1.0, %v795_v0 }
  0x58   : > { %v988_v12 = vmax.f32 %v275_v7, %v973_v6  ;;  %v419_v34 = vsel %vm300_vm0, %v404_v30, 0.0  ;;  %v297_v62 = vsel %vm294_vm1, %v963_v1, 0.0  ;;  %v334_v63 = vsel %vm331_vm2, %v965_v2, 0.0 }
  0x59   : > { %v313_v20 = vadd.f32 %v312_v13, %v311_v10  ;;  %v349_v21 = vadd.f32 %v348_v14, %v347_v11  ;;  %v385_v33 = vadd.f32 %v384_v29, %v383_v22  ;;  %v420_v40 = vrot.slane %v419_v34, 4 }
  0x5a   : > { %v277_v16 = vsub.f32 %v963_v1, %v988_v12  ;;  %v280_v17 = vsub.f32 %v965_v2, %v988_v12  ;;  %v283_v18 = vsub.f32 %v967_v3, %v988_v12  ;;  %v286_v19 = vsub.f32 %v973_v6, %v988_v12 }
  0x5b   : > { %v314_v27 = vrot.slane %v313_v20, 2  ;;  %v350_v28 = vrot.slane %v349_v21, 2  ;;  %v386_v37 = vrot.slane %v385_v33, 2  ;;  %v421_v44 = vadd.f32 %v420_v40, %v419_v34 }
  0x5c   : > { %v278_v23 = vmul.f32 1.442695, %v277_v16  ;;  %v281_v24 = vmul.f32 1.442695, %v280_v17  ;;  %v284_v25 = vmul.f32 1.442695, %v283_v18  ;;  %v335_v8 = vadd.f32 %v334_v63, %v297_v62 }
  0x5d   : > { %v287_v26 = vmul.f32 1.442695, %v286_v19  ;;  %v315_v31 = vadd.f32 %v314_v27, %v313_v20  ;;  %v351_v32 = vadd.f32 %v350_v28, %v349_v21  ;;  %v387_v43 = vadd.f32 %v386_v37, %v385_v33 }
  0x5e   : > { %663 = vpow2.f32 %v278_v23  ;;  %v310_v38 = vld [vmem:[%s957_s27 + $0x4] sm:$0x1]  ;;  %v346_v39 = vld [vmem:[%s957_s27 + $0x5] sm:$0x1]  ;;  %v382_v48 = vld [vmem:[%s957_s27 + $0x6] sm:$0x1] }
  0x5f   : > { %665 = vpow2.f32 %v281_v24  ;;  %v316_v35 = vrot.slane %v315_v31, 1  ;;  %v352_v36 = vrot.slane %v351_v32, 1  ;;  %v388_v47 = vrot.slane %v387_v43, 1  ;;  %v418_v59 = vld [vmem:[%s957_s27 + $0x7] sm:$0x1] }
  0x60   : > { %667 = vpow2.f32 %v284_v25  ;;  %v422_v49 = vrot.slane %v421_v44, 2  ;;  %v370_v9 = vsel %vm367_vm3, %v967_v3, 0.0  ;;  %v406_v11 = vsel %vm403_vm4, %v973_v6, 0.0 }
  0x61   : > { %669 = vpow2.f32 %v287_v26  ;;  %v317_v41 = vadd.f32 %v316_v35, %v315_v31  ;;  %v353_v42 = vadd.f32 %v352_v36, %v351_v32  ;;  %v389_v50 = vadd.f32 %v388_v47, %v387_v43 }
  0x62   : > { %v423_v52 = vadd.f32 %v422_v49, %v421_v44  ;;  %v371_v10 = vadd.f32 %v370_v9, %v335_v8  ;;  %vm438_vm5 = vcmp.gt.s32.totalorder %v971_v5, 0  ;;  %v356_v8 = vld [vmem:[%s957_s27 + $0x9] sm:$0x1] }
  0x63   : > { %v318_v45 = vadd.f32 %v317_v41, %v310_v38  ;;  %v354_v46 = vadd.f32 %v353_v42, %v346_v39  ;;  %v390_v54 = vadd.f32 %v389_v50, %v382_v48  ;;  %v1031_v18 = vsel %vm438_vm5, 1.0, %v795_v0 }
  0x64   : > { %v424_v57 = vrot.slane %v423_v52, 1  ;;  %v1027_v1 = vadd.f32 %v406_v11, %v371_v10 }
  0x65   : > { %319 = vst [vmem:[%s957_s27 + $0x4] sm:$0x1] %v318_v45  ;;  %355 = vst [vmem:[%s957_s27 + $0x5] sm:$0x1] %v354_v46 }
  0x66   : > { %391 = vst [vmem:[%s957_s27 + $0x6] sm:$0x1] %v390_v54  ;;  %v425_v61 = vadd.f32 %v424_v57, %v423_v52  ;;  %v440_v3 = vsub.f32 %v988_v12, %v1027_v1  ;;  %v299_v54 = vld [vmem:[%s957_s27] sm:$0x1] }
  0x68   : > { %v664_v51 = vpop.eup %663  ;;  %v426_v7 = vadd.f32 %v425_v61, %v418_v59  ;;  %v336_v59 = vld [vmem:[%s957_s27 + $0x1] sm:$0x1] }
  0x69   : > { %v666_v53 = vpop.eup %665 }
  0x6a   : > { %v668_v55 = vpop.eup %667  ;;  %v289_v56 = vadd.f32 %v666_v53, %v664_v51  ;;  %427 = vst [vmem:[%s957_s27 + $0x7] sm:$0x1] %v426_v7 }
  0x6b   : > { %v670_v58 = vpop.eup %669 }
  0x6c   : > { %v290_v60 = vadd.f32 %v668_v55, %v289_v56 }
  0x6e   : > { %v291_v4 = vadd.f32 %v670_v58, %v290_v60 }
  0x70   : > { %671 = vrcp.f32 %v291_v4 }
  0x71   : > { %673 = vlog2.f32 %v291_v4  ;;  %v320_v4 = vld [vmem:[%s957_s27 + $0x8] sm:$0x1] }
  0x7a   : > { %v672_v2 = vpop.eup %671 }
  0x7b   : > { %v674_v13 = vpop.eup %673  ;;  %v293_v14 = vmul.f32 %v672_v2, %v664_v51  ;;  %v330_v15 = vmul.f32 %v672_v2, %v666_v53  ;;  %v366_v16 = vmul.f32 %v672_v2, %v668_v55  ;;  %v402_v17 = vmul.f32 %v672_v2, %v670_v58 }
  0x7c   : > { %v1035_v19 = vmul.f32 0.6931472, %v674_v13  ;;  %v372_v13 = vld [vmem:[%s957_s27 + $0x2] sm:$0x1] }
  0x7d   : > { %v301_v6 = vsel %vm300_vm0, %v293_v14, 0.0  ;;  %v296_v20 = vsel %vm294_vm1, %v293_v14, 0.0  ;;  %v337_v21 = vsel %vm300_vm0, %v330_v15, 0.0  ;;  %v333_v22 = vsel %vm331_vm2, %v330_v15, 0.0 }
  0x7e   : > { %v302_v23 = vrot.slane %v301_v6, 4  ;;  %v321_v24 = vsel %vm300_vm0, %v296_v20, 0.0  ;;  %v338_v0 = vrot.slane %v337_v21, 4  ;;  %v357_v25 = vsel %vm300_vm0, %v333_v22, 0.0  ;;  %v392_v20 = vld [vmem:[%s957_s27 + $0xa] sm:$0x1] }
  0x7f   : > { %v322_v26 = vrot.slane %v321_v24, 4  ;;  %v358_v27 = vrot.slane %v357_v25, 4  ;;  %v373_v28 = vsel %vm300_vm0, %v366_v16, 0.0  ;;  %v369_v29 = vsel %vm367_vm3, %v366_v16, 0.0 }
  0x80   : > { %v303_v30 = vadd.f32 %v302_v23, %v301_v6  ;;  %v339_v31 = vadd.f32 %v338_v0, %v337_v21  ;;  %v374_v32 = vrot.slane %v373_v28, 4  ;;  %v393_v33 = vsel %vm300_vm0, %v369_v29, 0.0  ;;  %v408_v0 = vld [vmem:[%s957_s27 + $0x3] sm:$0x1] }
  0x81   : > { %v323_v34 = vadd.f32 %v322_v26, %v321_v24  ;;  %v359_v35 = vadd.f32 %v358_v27, %v357_v25  ;;  %v394_v36 = vrot.slane %v393_v33, 4  ;;  %v409_v37 = vsel %vm300_vm0, %v402_v17, 0.0 }
  0x82   : > { %v304_v38 = vrot.slane %v303_v30, 2  ;;  %v340_v39 = vrot.slane %v339_v31, 2  ;;  %v375_v40 = vadd.f32 %v374_v32, %v373_v28  ;;  %v410_v41 = vrot.slane %v409_v37, 4 }
  0x83   : > { %v324_v42 = vrot.slane %v323_v34, 2  ;;  %v360_v43 = vrot.slane %v359_v35, 2  ;;  %v395_v44 = vadd.f32 %v394_v36, %v393_v33  ;;  %v405_v45 = vsel %vm403_vm4, %v402_v17, 0.0 }
  0x84   : > { %v305_v46 = vadd.f32 %v304_v38, %v303_v30  ;;  %v341_v47 = vadd.f32 %v340_v39, %v339_v31  ;;  %v376_v48 = vrot.slane %v375_v40, 2  ;;  %v411_v49 = vadd.f32 %v410_v41, %v409_v37  ;;  %v445_v39 = vld [vmem:[%s957_s27 + $0xc] sm:$0x1] }
  0x85   : > { %v325_v50 = vadd.f32 %v324_v42, %v323_v34  ;;  %v361_v51 = vadd.f32 %v360_v43, %v359_v35  ;;  %v396_v52 = vrot.slane %v395_v44, 2  ;;  %v429_v53 = vsel %vm300_vm0, %v405_v45, 0.0  ;;  %v428_v34 = vld [vmem:[%s957_s27 + $0xb] sm:$0x1] }
  0x86   : > { %v306_v55 = vrot.slane %v305_v46, 1  ;;  %v342_v56 = vrot.slane %v341_v47, 1  ;;  %v377_v57 = vadd.f32 %v376_v48, %v375_v40  ;;  %v412_v58 = vrot.slane %v411_v49, 2 }
  0x87   : > { %v326_v5 = vrot.slane %v325_v50, 1  ;;  %v362_v60 = vrot.slane %v361_v51, 1  ;;  %v397_v61 = vadd.f32 %v396_v52, %v395_v44  ;;  %v430_v62 = vrot.slane %v429_v53, 4 }
  0x88   : > { %v307_v63 = vadd.f32 %v306_v55, %v305_v46  ;;  %v343_v7 = vadd.f32 %v342_v56, %v341_v47  ;;  %v378_v9 = vrot.slane %v377_v57, 1  ;;  %v413_v10 = vadd.f32 %v412_v58, %v411_v49 }
  0x89   : > { %v327_v11 = vadd.f32 %v326_v5, %v325_v50  ;;  %v363_v2 = vadd.f32 %v362_v60, %v361_v51  ;;  %v398_v14 = vrot.slane %v397_v61, 1  ;;  %v431_v15 = vadd.f32 %v430_v62, %v429_v53 }
  0x8a   : > { %v308_v16 = vadd.f32 %v307_v63, %v299_v54  ;;  %v344_v17 = vadd.f32 %v343_v7, %v336_v59  ;;  %v379_v6 = vadd.f32 %v378_v9, %v377_v57  ;;  %v414_v21 = vrot.slane %v413_v10, 1 }
  0x8b   : > { %v328_v22 = vadd.f32 %v327_v11, %v320_v4  ;;  %v364_v23 = vadd.f32 %v363_v2, %v356_v8  ;;  %v399_v24 = vadd.f32 %v398_v14, %v397_v61  ;;  %v432_v25 = vrot.slane %v431_v15, 2 }
  0x8c   : > { %309 = vst [vmem:[%s957_s27] sm:$0x1] %v308_v16  ;;  %345 = vst [vmem:[%s957_s27 + $0x1] sm:$0x1] %v344_v17  ;;  %v380_v26 = vadd.f32 %v379_v6, %v372_v13  ;;  %v415_v27 = vadd.f32 %v414_v21, %v413_v10  ;;  %v443_v28 = vadd.f32 %v1035_v19, %v440_v3 }
  0x8d   : > { %329 = vst [vmem:[%s957_s27 + $0x8] sm:$0x1] %v328_v22  ;;  %365 = vst [vmem:[%s957_s27 + $0x9] sm:$0x1] %v364_v23  ;;  %v400_v29 = vadd.f32 %v399_v24, %v392_v20  ;;  %v433_v30 = vadd.f32 %v432_v25, %v431_v15 }
  0x8e   : > { %381 = vst [vmem:[%s957_s27 + $0x2] sm:$0x1] %v380_v26  ;;  %v416_v31 = vadd.f32 %v415_v27, %v408_v0  ;;  %v444_v32 = vmul.f32 %v443_v28, %v1031_v18 }
  0x8f   : > { %401 = vst [vmem:[%s957_s27 + $0xa] sm:$0x1] %v400_v29  ;;  %v434_v33 = vrot.slane %v433_v30, 1 }
  0x90   : > { %417 = vst [vmem:[%s957_s27 + $0x3] sm:$0x1] %v416_v31  ;;  %v446_v35 = vsel %vm300_vm0, %v444_v32, 0.0 }
  0x91   : > { %v435_v12 = vadd.f32 %v434_v33, %v433_v30  ;;  %v447_v1 = vrot.slane %v446_v35, 4 }
  0x93   : > { %v436_v3 = vadd.f32 %v435_v12, %v428_v34  ;;  %v448_v19 = vadd.f32 %v447_v1, %v446_v35 }
  0x95   : > { %437 = vst [vmem:[%s957_s27 + $0xb] sm:$0x1] %v436_v3  ;;  %v449_v36 = vrot.slane %v448_v19, 2 }
  0x97   : > { %v450_v37 = vadd.f32 %v449_v36, %v448_v19 }
  0x99   : > { %v451_v38 = vrot.slane %v450_v37, 1 }
  0x9b   : > { %v452_v40 = vadd.f32 %v451_v38, %v450_v37 }
  0x9d   : > { %v453_v41 = vadd.f32 %v452_v40, %v445_v39 }
  0x9f   : > { %454 = vst [vmem:[%s957_s27 + $0xc] sm:$0x1] %v453_v41 }
  0xa0 PF: > { %s18_s14 = sadd.s32 1, %s789_s14   ;;  %s1105_s9 = smov %s773_s10 }
  0xa1   : > { %p15_p9 = scmp.ge.s32.totalorder %s18_s14, 4   ;;  %s1106_s10 = smov %s777_s11 }
  0xa2   : > { %s1107_s11 = smov %s860_s21  ;;  %s1108_s12 = smov %s785_s13 }
  0xa3   : > { %s1109_s13 = smov %s1111_s16  ;;  %17 = sbr.rel (!%p15_p9) target bundleno = 6 (0x6), region = 88 }
  0xaa   :  { %484 = vsyncpa [#allocation3], 1 }
  0xab   :  { %486 = vsyncpa [#allocation3 + $0x1], 1 }
  0xac   :  { %487 = vsyncpa [#allocation5], 1 }
  0xad   :  { %489 = vsyncpa [#allocation5 + $0x1], 1 }

</bundles_post_ra>
